<compile_context>
chip_gen: v7x
topology: tpu7x:2x2x1
jax: 0.10.0
libtpu: 0.0.40
codegen_flags: <defaults>
</compile_context>

<pallas_src>
import functools

import jax
import jax.numpy as jnp
from jax.experimental import pallas as pl
from jax.experimental.pallas import tpu as pltpu


# ---------------------------------------------------------------------------
# Fused kernel: one grid axis over decoder output-column blocks.
# ---------------------------------------------------------------------------
def _graphvae_fused_kernel(
    a_ref, x_ref,
    w1_ref, b1_ref, w2_ref, b2_ref,
    p_ref,
    wmulv_ref, bmulv_ref,
    eps_ref,
    wd1_ref, bd1_ref, wd2_ref, bd2_ref,
    wd3s_ref, bd3s_ref,
    offdiag_ref,
    probs_ref, muv_ref,
    *, lat_dim, matmul_dtype,
):
    f32 = jnp.float32
    md = matmul_dtype

    def mm(lhs, rhs):
        # bf16 MXU operands, f32 accumulation.
        return jnp.dot(lhs, rhs, preferred_element_type=f32)

    a = a_ref[...]          # [Nn, Nn] bf16 normalized adjacency D^-1/2(A+I)D^-1/2
    x = x_ref[...]          # [Nn, in_dim] bf16

    # --- Encoder (tiny; recomputed per column-block grid step) --------------
    # GCN layer 1 / 2: relu(A_hat @ (H @ W) + b); elementwise kept in f32.
    h = jnp.maximum(mm(a, mm(x, w1_ref[...]).astype(md)) + b1_ref[...], 0.0)
    h = jnp.maximum(mm(a, mm(h.astype(md), w2_ref[...]).astype(md))
                    + b2_ref[...], 0.0)

    # global_mean_pool as a matmul with the [B, Nn] pooling operator.
    g = mm(p_ref[...], h.astype(md))                             # [B, hid]

    # Fused mu/logv head: single matmul -> lane-packed [B, 2*lat] output.
    muv = mm(g.astype(md), wmulv_ref[...]) + bmulv_ref[...]      # [B, 2*lat]
    muv_ref[...] = muv
    mu = muv[:, :lat_dim]
    logv = muv[:, lat_dim:]
    z = mu + jnp.exp(0.5 * logv) * eps_ref[...]                  # [B, lat]

    # --- Decoder MLP: lat -> hid -> hid -> column block of N_max^2 ----------
    d = jnp.maximum(mm(z.astype(md), wd1_ref[...]) + bd1_ref[...], 0.0)
    d = jnp.maximum(mm(d.astype(md), wd2_ref[...]) + bd2_ref[...], 0.0)
    # wd3s/bd3s already have (logits + logits^T)/2 folded in (exact symmetry).
    logits = mm(d.astype(md), wd3s_ref[...]) + bd3s_ref[...]     # [B, blk]

    # Zero the diagonal AFTER the sigmoid (== masked_fill(-9e15) -> sigmoid).
    probs_ref[...] = jax.nn.sigmoid(logits) * offdiag_ref[...]   # [B, blk]


# ---------------------------------------------------------------------------
# Param prep: bf16 casts, mu/logv fusion, transpose folded into wd3.
# ---------------------------------------------------------------------------
def prepare_kernel_params(params, N_max, matmul_dtype=jnp.bfloat16):
    md = matmul_dtype
    nm2 = N_max * N_max
    idx = jnp.arange(nm2)
    i = idx // N_max
    j = idx % N_max
    t = j * N_max + i                       # flat index of the transposed slot
    # Fold symmetrization into the last decoder layer (exact: columns k and
    # t(k) become bit-identical, so the decoded logits are exactly symmetric).
    wd3_sym = 0.5 * (params["wd3"] + params["wd3"][:, t])
    bd3_sym = 0.5 * (params["bd3"] + params["bd3"][:, t])
    offdiag = (i != j).astype(jnp.float32).reshape(1, nm2)
    # Fuse mu / logv heads into one matmul.
    wmulv = jnp.concatenate([params["wmu"], params["wlv"]], axis=1)
    bmulv = jnp.concatenate([params["bmu"], params["blv"]], axis=1)
    return dict(
        w1=params["w1"].astype(md), b1=params["b1"],
        w2=params["w2"].astype(md), b2=params["b2"],
        wmulv=wmulv.astype(md), bmulv=bmulv,
        wd1=params["wd1"].astype(md), bd1=params["bd1"],
        wd2=params["wd2"].astype(md), bd2=params["bd2"],
        wd3s=wd3_sym.astype(md), bd3s=bd3_sym,
        offdiag=offdiag,
    )


def _pick_col_block(nm2):
    """Largest lane-dense (multiple of 128) column block dividing N_max^2."""
    for cb in (2048, 1024, 512, 256, 128):
        if nm2 >= cb and nm2 % cb == 0:
            return cb
    return nm2


# ---------------------------------------------------------------------------
# Forward wrapper
# ---------------------------------------------------------------------------
def graphvae_forward(kparams, x, a_hat, pool, eps, *, N, N_max,
                     matmul_dtype=jnp.bfloat16):
    """Returns (adj_hat [B, N, N], mu [B, lat], logv [B, lat])."""
    md = matmul_dtype
    num_nodes, in_dim = x.shape
    B = pool.shape[0]
    hid_dim = kparams["w1"].shape[1]
    lat_dim = kparams["wmulv"].shape[1] // 2
    nm2 = N_max * N_max
    col_block = _pick_col_block(nm2)
    n_blocks = nm2 // col_block

    # Pre-cast the (non-weight) matmul operands once in the wrapper.
    a_bf = a_hat.astype(md)
    x_bf = x.astype(md)
    pool_bf = pool.astype(md)

    inputs = (
        a_bf, x_bf,
        kparams["w1"], kparams["b1"], kparams["w2"], kparams["b2"],
        pool_bf,
        kparams["wmulv"], kparams["bmulv"],
        eps,
        kparams["wd1"], kparams["bd1"], kparams["wd2"], kparams["bd2"],
        kparams["wd3s"], kparams["bd3s"],
        kparams["offdiag"],
    )

    def full(arr):
        return pl.BlockSpec(arr.shape, lambda j: (0, 0))

    in_specs = [
        full(a_bf), full(x_bf),
        full(kparams["w1"]), full(kparams["b1"]),
        full(kparams["w2"]), full(kparams["b2"]),
        full(pool_bf),
        full(kparams["wmulv"]), full(kparams["bmulv"]),
        full(eps),
        full(kparams["wd1"]), full(kparams["bd1"]),
        full(kparams["wd2"]), full(kparams["bd2"]),
        # Decoder layer-3 weight / bias / mask are pipelined over column blocks.
        pl.BlockSpec((hid_dim, col_block), lambda j: (0, j)),
        pl.BlockSpec((1, col_block), lambda j: (0, j)),
        pl.BlockSpec((1, col_block), lambda j: (0, j)),
    ]
    out_specs = (
        pl.BlockSpec((B, col_block), lambda j: (0, j)),      # probs (lane-dense)
        pl.BlockSpec((B, 2 * lat_dim), lambda j: (0, 0)),    # packed mu|logv
    )

    # Advisory cost estimate (permutation matmul removed).
    macs = n_blocks * (
        num_nodes * in_dim * hid_dim            # x @ w1
        + num_nodes * num_nodes * hid_dim       # a_hat @ h1
        + num_nodes * hid_dim * hid_dim         # h @ w2
        + num_nodes * num_nodes * hid_dim       # a_hat @ h2
        + B * num_nodes * hid_dim               # pool @ h
        + B * hid_dim * 2 * lat_dim             # fused mu/logv head
        + B * lat_dim * hid_dim                 # dec layer 1
        + B * hid_dim * hid_dim                 # dec layer 2
    ) + B * hid_dim * nm2                       # dec layer 3 (across blocks)
    in_bytes = sum(int(t.size) * t.dtype.itemsize for t in inputs)
    out_bytes = (B * nm2 + B * 2 * lat_dim) * 4
    cost = pl.CostEstimate(
        flops=int(2 * macs),
        transcendentals=int(n_blocks * B * lat_dim + B * nm2),
        bytes_accessed=int(in_bytes + out_bytes),
    )

    probs_flat, muv = pl.pallas_call(
        functools.partial(_graphvae_fused_kernel, lat_dim=lat_dim,
                          matmul_dtype=md),
        grid=(n_blocks,),
        out_shape=(
            jax.ShapeDtypeStruct((B, nm2), jnp.float32),
            jax.ShapeDtypeStruct((B, 2 * lat_dim), jnp.float32),
        ),
        in_specs=in_specs,
        out_specs=out_specs,
        compiler_params=pltpu.CompilerParams(
            dimension_semantics=("arbitrary",),
            vmem_limit_bytes=32 * 1024 * 1024,
        ),
        cost_estimate=cost,
    )(*inputs)

    # Minimal wrapper-side glue on the final (lane-dense) kernel outputs.
    mu = muv[:, :lat_dim]
    logv = muv[:, lat_dim:]
    probs_full = probs_flat.reshape(B, N_max, N_max)
    adj_hat = probs_full[:, :N, :N]
    return adj_hat, mu, logv


# ---------------------------------------------------------------------------
# Synthetic params / graph operators / pure-JAX reference (glue, not kernel)
# ---------------------------------------------------------------------------
def init_params(key, in_dim, hid_dim, lat_dim, N_max):
    """Deterministic synthetic parameter init (shapes match the nn.Module)."""
    ks = jax.random.split(key, 7)

    def lin(k, fan_in, fan_out):
        bound = 1.0 / jnp.sqrt(jnp.float32(fan_in))
        w = jax.random.uniform(k, (fan_in, fan_out), jnp.float32, -bound, bound)
        b = jnp.zeros((1, fan_out), jnp.float32)
        return w, b

    w1, b1 = lin(ks[0], in_dim, hid_dim)            # GCNConv enc1
    w2, b2 = lin(ks[1], hid_dim, hid_dim)           # GCNConv enc2
    wmu, bmu = lin(ks[2], hid_dim, lat_dim)         # mu head
    wlv, blv = lin(ks[3], hid_dim, lat_dim)         # logv head
    wd1, bd1 = lin(ks[4], lat_dim, hid_dim)         # dec[0]
    wd2, bd2 = lin(ks[5], hid_dim, hid_dim)         # dec[2]
    wd3, bd3 = lin(ks[6], hid_dim, N_max * N_max)   # dec[4]
    return dict(
        w1=w1, b1=b1, w2=w2, b2=b2,
        wmu=wmu, bmu=bmu, wlv=wlv, blv=blv,
        wd1=wd1, bd1=bd1, wd2=wd2, bd2=bd2, wd3=wd3, bd3=bd3,
    )


def build_graph_operators(key, num_nodes, batch, B):
    """Dense normalized adjacency (GCN A_hat) and mean-pool matrix (glue)."""
    # TODO(synk): sparse edge_index message passing (GCNConv) and the
    # scatter-style global_mean_pool are expressed here as dense matmul
    # operators built host-side; the kernel consumes the dense forms.
    r = jax.random.uniform(key, (num_nodes, num_nodes))
    upper = jnp.triu(r, k=1) > 0.6
    adj = (upper | upper.T).astype(jnp.float32)
    same_graph = (batch[:, None] == batch[None, :]).astype(jnp.float32)
    adj = adj * same_graph
    # GCN normalization with self loops: D^{-1/2} (A + I) D^{-1/2}
    a_tilde = adj + jnp.eye(num_nodes, dtype=jnp.float32)
    deg = jnp.sum(a_tilde, axis=1)
    dinv = 1.0 / jnp.sqrt(deg)
    a_hat = a_tilde * dinv[:, None] * dinv[None, :]
    # mean pooling matrix [B, num_nodes]
    onehot = (batch[None, :] == jnp.arange(B)[:, None]).astype(jnp.float32)
    counts = jnp.sum(onehot, axis=1, keepdims=True)
    pool = onehot / counts
    return a_hat, pool


def graphvae_reference(params, x, a_hat, pool, eps, *, N, N_max):
    """Pure-JAX f32 reference mirroring the PyTorch module."""
    relu = jax.nn.relu
    h = relu(a_hat @ (x @ params["w1"]) + params["b1"])
    h = relu(a_hat @ (h @ params["w2"]) + params["b2"])
    g = pool @ h
    mu = g @ params["wmu"] + params["bmu"]
    logv = g @ params["wlv"] + params["blv"]
    z = mu + jnp.exp(0.5 * logv) * eps
    d = relu(z @ params["wd1"] + params["bd1"])
    d = relu(d @ params["wd2"] + params["bd2"])
    logits = (d @ params["wd3"] + params["bd3"]).reshape(-1, N_max, N_max)
    logits = 0.5 * (logits + jnp.swapaxes(logits, 1, 2))
    eye = jnp.eye(N_max, dtype=bool)
    logits = jnp.where(eye[None], jnp.float32(-9e15), logits)
    probs = jax.nn.sigmoid(logits)
    return probs[:, :N, :N], mu, logv


if __name__ == "__main__":
    # Small shapes consistent with the module's forward.
    num_nodes = 16      # total nodes in the batched graph (data.num_nodes-ish)
    in_dim = 8
    hid_dim = 32
    lat_dim = 8
    N_max = 16
    B = 2               # two graphs of 8 nodes each
    N = 12              # slice size requested at decode time

    key = jax.random.PRNGKey(0)
    k_x, k_g, k_eps, k_p = jax.random.split(key, 4)

    x = jax.random.normal(k_x, (num_nodes, in_dim), jnp.float32)
    batch = jnp.concatenate([jnp.zeros(8, jnp.int32), jnp.ones(8, jnp.int32)])
    a_hat, pool = build_graph_operators(k_g, num_nodes, batch, B)
    eps = jax.random.normal(k_eps, (B, lat_dim), jnp.float32)   # randn_like(std)

    params = init_params(k_p, in_dim, hid_dim, lat_dim, N_max)
    kparams = prepare_kernel_params(params, N_max)

    adj_hat, mu, logv = graphvae_forward(
        kparams, x, a_hat, pool, eps, N=N, N_max=N_max)
    jax.block_until_ready((adj_hat, mu, logv))

    # Structural checks (exact by construction: folded wd3 columns are
    # bit-identical -> exact symmetry; diag is multiplied by 0).
    assert adj_hat.shape == (B, N, N)
    assert mu.shape == (B, lat_dim) and logv.shape == (B, lat_dim)
    assert float(jnp.max(jnp.abs(jnp.diagonal(adj_hat, axis1=1, axis2=2)))) < 1e-6
    assert float(jnp.max(jnp.abs(adj_hat - jnp.swapaxes(adj_hat, 1, 2)))) < 1e-6
    assert bool(jnp.all(jnp.isfinite(adj_hat)))
    assert bool(jnp.all((adj_hat >= 0.0) & (adj_hat <= 1.0)))

    # Numerical check vs pure-JAX reference (loose tol: bf16 MXU operands).
    ref_adj, ref_mu, ref_logv = graphvae_reference(
        params, x, a_hat, pool, eps, N=N, N_max=N_max)
    assert float(jnp.max(jnp.abs(adj_hat - ref_adj))) < 5e-2
    assert float(jnp.max(jnp.abs(mu - ref_mu))) < 5e-2
    assert float(jnp.max(jnp.abs(logv - ref_logv))) < 5e-2

    print("KERNEL_OK")
</pallas_src>

<mosaic_0001>
module attributes {stable_mosaic.version = 11 : i64} {
  func.func @_graphvae_fused_kernel(%arg0: i32, %arg1: memref<16x16xbf16, #tpu.memory_space<vmem>>, %arg2: memref<16x8xbf16, #tpu.memory_space<vmem>>, %arg3: memref<8x32xbf16, #tpu.memory_space<vmem>>, %arg4: memref<1x32xf32, #tpu.memory_space<vmem>>, %arg5: memref<32x32xbf16, #tpu.memory_space<vmem>>, %arg6: memref<1x32xf32, #tpu.memory_space<vmem>>, %arg7: memref<2x16xbf16, #tpu.memory_space<vmem>>, %arg8: memref<32x16xbf16, #tpu.memory_space<vmem>>, %arg9: memref<1x16xf32, #tpu.memory_space<vmem>>, %arg10: memref<2x8xf32, #tpu.memory_space<vmem>>, %arg11: memref<8x32xbf16, #tpu.memory_space<vmem>>, %arg12: memref<1x32xf32, #tpu.memory_space<vmem>>, %arg13: memref<32x32xbf16, #tpu.memory_space<vmem>>, %arg14: memref<1x32xf32, #tpu.memory_space<vmem>>, %arg15: memref<32x256xbf16, #tpu.memory_space<vmem>>, %arg16: memref<1x256xf32, #tpu.memory_space<vmem>>, %arg17: memref<1x256xf32, #tpu.memory_space<vmem>>, %arg18: memref<2x256xf32, #tpu.memory_space<vmem>>, %arg19: memref<2x16xf32, #tpu.memory_space<vmem>>) attributes {dimension_semantics = [#tpu.dimension_semantics<arbitrary>], iteration_bounds = array<i64: 1>, scalar_prefetch = 0 : i64, scratch_operands = 0 : i64, tpu.core_type = #tpu.core_type<tc>, window_params = [{pipeline_mode = #tpu.pipeline_mode<synchronous>, transform_indices = @transform_0, window_bounds = array<i64: 16, 16>}, {pipeline_mode = #tpu.pipeline_mode<synchronous>, transform_indices = @transform_1, window_bounds = array<i64: 16, 8>}, {pipeline_mode = #tpu.pipeline_mode<synchronous>, transform_indices = @transform_2, window_bounds = array<i64: 8, 32>}, {pipeline_mode = #tpu.pipeline_mode<synchronous>, transform_indices = @transform_3, window_bounds = array<i64: 1, 32>}, {pipeline_mode = #tpu.pipeline_mode<synchronous>, transform_indices = @transform_4, window_bounds = array<i64: 32, 32>}, {pipeline_mode = #tpu.pipeline_mode<synchronous>, transform_indices = @transform_5, window_bounds = array<i64: 1, 32>}, {pipeline_mode = #tpu.pipeline_mode<synchronous>, transform_indices = @transform_6, window_bounds = array<i64: 2, 16>}, {pipeline_mode = #tpu.pipeline_mode<synchronous>, transform_indices = @transform_7, window_bounds = array<i64: 32, 16>}, {pipeline_mode = #tpu.pipeline_mode<synchronous>, transform_indices = @transform_8, window_bounds = array<i64: 1, 16>}, {pipeline_mode = #tpu.pipeline_mode<synchronous>, transform_indices = @transform_9, window_bounds = array<i64: 2, 8>}, {pipeline_mode = #tpu.pipeline_mode<synchronous>, transform_indices = @transform_10, window_bounds = array<i64: 8, 32>}, {pipeline_mode = #tpu.pipeline_mode<synchronous>, transform_indices = @transform_11, window_bounds = array<i64: 1, 32>}, {pipeline_mode = #tpu.pipeline_mode<synchronous>, transform_indices = @transform_12, window_bounds = array<i64: 32, 32>}, {pipeline_mode = #tpu.pipeline_mode<synchronous>, transform_indices = @transform_13, window_bounds = array<i64: 1, 32>}, {transform_indices = @transform_14, window_bounds = array<i64: 32, 256>}, {transform_indices = @transform_15, window_bounds = array<i64: 1, 256>}, {transform_indices = @transform_16, window_bounds = array<i64: 1, 256>}, {transform_indices = @transform_17, window_bounds = array<i64: 2, 256>}, {pipeline_mode = #tpu.pipeline_mode<synchronous>, transform_indices = @transform_18, window_bounds = array<i64: 2, 16>}]} {
    %c0 = arith.constant 0 : index
    %c0_0 = arith.constant 0 : index
    %0 = vector.load %arg1[%c0, %c0_0] : memref<16x16xbf16, #tpu.memory_space<vmem>>, vector<16x16xbf16>
    %c0_1 = arith.constant 0 : index
    %c0_2 = arith.constant 0 : index
    %1 = vector.load %arg2[%c0_1, %c0_2] : memref<16x8xbf16, #tpu.memory_space<vmem>>, vector<16x8xbf16>
    %c0_3 = arith.constant 0 : index
    %c0_4 = arith.constant 0 : index
    %2 = vector.load %arg3[%c0_3, %c0_4] : memref<8x32xbf16, #tpu.memory_space<vmem>>, vector<8x32xbf16>
    %cst = arith.constant dense<0.000000e+00> : vector<16x32xf32>
    %3 = tpu.matmul %1, %2, %cst {dimension_numbers = #tpu.dot_dimension_numbers<[1], [0], [0], [1], [0, 0, 1, 1], [], []>} : vector<16x8xbf16>, vector<8x32xbf16>, vector<16x32xf32> -> vector<16x32xf32>
    %4 = arith.truncf %3 : vector<16x32xf32> to vector<16x32xbf16>
    %cst_5 = arith.constant dense<0.000000e+00> : vector<16x32xf32>
    %5 = tpu.matmul %0, %4, %cst_5 {dimension_numbers = #tpu.dot_dimension_numbers<[1], [0], [0], [1], [0, 0, 1, 1], [], []>} : vector<16x16xbf16>, vector<16x32xbf16>, vector<16x32xf32> -> vector<16x32xf32>
    %c0_6 = arith.constant 0 : index
    %c0_7 = arith.constant 0 : index
    %6 = vector.load %arg4[%c0_6, %c0_7] : memref<1x32xf32, #tpu.memory_space<vmem>>, vector<1x32xf32>
    %7 = vector.broadcast %6 : vector<1x32xf32> to vector<16x32xf32>
    %8 = arith.addf %5, %7 : vector<16x32xf32>
    %cst_8 = arith.constant 0.000000e+00 : f32
    %9 = vector.broadcast %cst_8 : f32 to vector<16x32xf32>
    %10 = arith.maximumf %8, %9 : vector<16x32xf32>
    %11 = arith.truncf %10 : vector<16x32xf32> to vector<16x32xbf16>
    %c0_9 = arith.constant 0 : index
    %c0_10 = arith.constant 0 : index
    %12 = vector.load %arg5[%c0_9, %c0_10] : memref<32x32xbf16, #tpu.memory_space<vmem>>, vector<32x32xbf16>
    %cst_11 = arith.constant dense<0.000000e+00> : vector<16x32xf32>
    %13 = tpu.matmul %11, %12, %cst_11 {dimension_numbers = #tpu.dot_dimension_numbers<[1], [0], [0], [1], [0, 0, 1, 1], [], []>} : vector<16x32xbf16>, vector<32x32xbf16>, vector<16x32xf32> -> vector<16x32xf32>
    %14 = arith.truncf %13 : vector<16x32xf32> to vector<16x32xbf16>
    %cst_12 = arith.constant dense<0.000000e+00> : vector<16x32xf32>
    %15 = tpu.matmul %0, %14, %cst_12 {dimension_numbers = #tpu.dot_dimension_numbers<[1], [0], [0], [1], [0, 0, 1, 1], [], []>} : vector<16x16xbf16>, vector<16x32xbf16>, vector<16x32xf32> -> vector<16x32xf32>
    %c0_13 = arith.constant 0 : index
    %c0_14 = arith.constant 0 : index
    %16 = vector.load %arg6[%c0_13, %c0_14] : memref<1x32xf32, #tpu.memory_space<vmem>>, vector<1x32xf32>
    %17 = vector.broadcast %16 : vector<1x32xf32> to vector<16x32xf32>
    %18 = arith.addf %15, %17 : vector<16x32xf32>
    %cst_15 = arith.constant 0.000000e+00 : f32
    %19 = vector.broadcast %cst_15 : f32 to vector<16x32xf32>
    %20 = arith.maximumf %18, %19 : vector<16x32xf32>
    %c0_16 = arith.constant 0 : index
    %c0_17 = arith.constant 0 : index
    %21 = vector.load %arg7[%c0_16, %c0_17] : memref<2x16xbf16, #tpu.memory_space<vmem>>, vector<2x16xbf16>
    %22 = arith.truncf %20 : vector<16x32xf32> to vector<16x32xbf16>
    %cst_18 = arith.constant dense<0.000000e+00> : vector<2x32xf32>
    %23 = tpu.matmul %21, %22, %cst_18 {dimension_numbers = #tpu.dot_dimension_numbers<[1], [0], [0], [1], [0, 0, 1, 1], [], []>} : vector<2x16xbf16>, vector<16x32xbf16>, vector<2x32xf32> -> vector<2x32xf32>
    %24 = arith.truncf %23 : vector<2x32xf32> to vector<2x32xbf16>
    %c0_19 = arith.constant 0 : index
    %c0_20 = arith.constant 0 : index
    %25 = vector.load %arg8[%c0_19, %c0_20] : memref<32x16xbf16, #tpu.memory_space<vmem>>, vector<32x16xbf16>
    %cst_21 = arith.constant dense<0.000000e+00> : vector<2x16xf32>
    %26 = tpu.matmul %24, %25, %cst_21 {dimension_numbers = #tpu.dot_dimension_numbers<[1], [0], [0], [1], [0, 0, 1, 1], [], []>} : vector<2x32xbf16>, vector<32x16xbf16>, vector<2x16xf32> -> vector<2x16xf32>
    %c0_22 = arith.constant 0 : index
    %c0_23 = arith.constant 0 : index
    %27 = vector.load %arg9[%c0_22, %c0_23] : memref<1x16xf32, #tpu.memory_space<vmem>>, vector<1x16xf32>
    %28 = vector.broadcast %27 : vector<1x16xf32> to vector<2x16xf32>
    %29 = arith.addf %26, %28 : vector<2x16xf32>
    %c0_24 = arith.constant 0 : index
    %c0_25 = arith.constant 0 : index
    %30 = vector.load %arg19[%c0_24, %c0_25] : memref<2x16xf32, #tpu.memory_space<vmem>>, vector<2x16xf32>
    tpu.vector_store %arg19[%c0_24, %c0_25], %29 {strides = array<i32>} : memref<2x16xf32, #tpu.memory_space<vmem>>, vector<2x16xf32>,
    %31 = vector.extract_strided_slice %29 {offsets = [0, 0], sizes = [2, 8], strides = [1, 1]} : vector<2x16xf32> to vector<2x8xf32>
    %32 = vector.extract_strided_slice %29 {offsets = [0, 8], sizes = [2, 8], strides = [1, 1]} : vector<2x16xf32> to vector<2x8xf32>
    %cst_26 = arith.constant 5.000000e-01 : f32
    %33 = vector.broadcast %cst_26 : f32 to vector<2x8xf32>
    %34 = arith.mulf %33, %32 : vector<2x8xf32>
    %35 = math.exp %34 : vector<2x8xf32>
    %c0_27 = arith.constant 0 : index
    %c0_28 = arith.constant 0 : index
    %36 = vector.load %arg10[%c0_27, %c0_28] : memref<2x8xf32, #tpu.memory_space<vmem>>, vector<2x8xf32>
    %37 = arith.mulf %35, %36 : vector<2x8xf32>
    %38 = arith.addf %31, %37 : vector<2x8xf32>
    %39 = arith.truncf %38 : vector<2x8xf32> to vector<2x8xbf16>
    %c0_29 = arith.constant 0 : index
    %c0_30 = arith.constant 0 : index
    %40 = vector.load %arg11[%c0_29, %c0_30] : memref<8x32xbf16, #tpu.memory_space<vmem>>, vector<8x32xbf16>
    %cst_31 = arith.constant dense<0.000000e+00> : vector<2x32xf32>
    %41 = tpu.matmul %39, %40, %cst_31 {dimension_numbers = #tpu.dot_dimension_numbers<[1], [0], [0], [1], [0, 0, 1, 1], [], []>} : vector<2x8xbf16>, vector<8x32xbf16>, vector<2x32xf32> -> vector<2x32xf32>
    %c0_32 = arith.constant 0 : index
    %c0_33 = arith.constant 0 : index
    %42 = vector.load %arg12[%c0_32, %c0_33] : memref<1x32xf32, #tpu.memory_space<vmem>>, vector<1x32xf32>
    %43 = vector.broadcast %42 : vector<1x32xf32> to vector<2x32xf32>
    %44 = arith.addf %41, %43 : vector<2x32xf32>
    %cst_34 = arith.constant 0.000000e+00 : f32
    %45 = vector.broadcast %cst_34 : f32 to vector<2x32xf32>
    %46 = arith.maximumf %44, %45 : vector<2x32xf32>
    %47 = arith.truncf %46 : vector<2x32xf32> to vector<2x32xbf16>
    %c0_35 = arith.constant 0 : index
    %c0_36 = arith.constant 0 : index
    %48 = vector.load %arg13[%c0_35, %c0_36] : memref<32x32xbf16, #tpu.memory_space<vmem>>, vector<32x32xbf16>
    %cst_37 = arith.constant dense<0.000000e+00> : vector<2x32xf32>
    %49 = tpu.matmul %47, %48, %cst_37 {dimension_numbers = #tpu.dot_dimension_numbers<[1], [0], [0], [1], [0, 0, 1, 1], [], []>} : vector<2x32xbf16>, vector<32x32xbf16>, vector<2x32xf32> -> vector<2x32xf32>
    %c0_38 = arith.constant 0 : index
    %c0_39 = arith.constant 0 : index
    %50 = vector.load %arg14[%c0_38, %c0_39] : memref<1x32xf32, #tpu.memory_space<vmem>>, vector<1x32xf32>
    %51 = vector.broadcast %50 : vector<1x32xf32> to vector<2x32xf32>
    %52 = arith.addf %49, %51 : vector<2x32xf32>
    %cst_40 = arith.constant 0.000000e+00 : f32
    %53 = vector.broadcast %cst_40 : f32 to vector<2x32xf32>
    %54 = arith.maximumf %52, %53 : vector<2x32xf32>
    %55 = arith.truncf %54 : vector<2x32xf32> to vector<2x32xbf16>
    %c0_41 = arith.constant 0 : index
    %c0_42 = arith.constant 0 : index
    %56 = vector.load %arg15[%c0_41, %c0_42] : memref<32x256xbf16, #tpu.memory_space<vmem>>, vector<32x256xbf16>
    %cst_43 = arith.constant dense<0.000000e+00> : vector<2x256xf32>
    %57 = tpu.matmul %55, %56, %cst_43 {dimension_numbers = #tpu.dot_dimension_numbers<[1], [0], [0], [1], [0, 0, 1, 1], [], []>} : vector<2x32xbf16>, vector<32x256xbf16>, vector<2x256xf32> -> vector<2x256xf32>
    %c0_44 = arith.constant 0 : index
    %c0_45 = arith.constant 0 : index
    %58 = vector.load %arg16[%c0_44, %c0_45] : memref<1x256xf32, #tpu.memory_space<vmem>>, vector<1x256xf32>
    %59 = vector.broadcast %58 : vector<1x256xf32> to vector<2x256xf32>
    %60 = arith.addf %57, %59 : vector<2x256xf32>
    %61 = arith.negf %60 : vector<2x256xf32>
    %62 = math.exp %61 : vector<2x256xf32>
    %cst_46 = arith.constant 1.000000e+00 : f32
    %63 = vector.broadcast %cst_46 : f32 to vector<2x256xf32>
    %64 = arith.addf %63, %62 : vector<2x256xf32>
    %65 = arith.divf %63, %64 : vector<2x256xf32>
    %c0_47 = arith.constant 0 : index
    %c0_48 = arith.constant 0 : index
    %66 = vector.load %arg17[%c0_47, %c0_48] : memref<1x256xf32, #tpu.memory_space<vmem>>, vector<1x256xf32>
    %67 = vector.broadcast %66 : vector<1x256xf32> to vector<2x256xf32>
    %68 = arith.mulf %65, %67 : vector<2x256xf32>
    %c0_49 = arith.constant 0 : index
    %c0_50 = arith.constant 0 : index
    %69 = vector.load %arg18[%c0_49, %c0_50] : memref<2x256xf32, #tpu.memory_space<vmem>>, vector<2x256xf32>
    tpu.vector_store %arg18[%c0_49, %c0_50], %68 {strides = array<i32>} : memref<2x256xf32, #tpu.memory_space<vmem>>, vector<2x256xf32>,
    return
  }
  func.func @transform_0(%arg0: i32) -> (i32, i32) {
    %c0_i32 = arith.constant 0 : i32
    %c0_i32_0 = arith.constant 0 : i32
    %c0_i32_1 = arith.constant 0 : i32
    return %c0_i32, %c0_i32_0 : i32, i32
  }
  func.func @transform_1(%arg0: i32) -> (i32, i32) {
    %c0_i32 = arith.constant 0 : i32
    %c0_i32_0 = arith.constant 0 : i32
    %c0_i32_1 = arith.constant 0 : i32
    return %c0_i32, %c0_i32_0 : i32, i32
  }
  func.func @transform_2(%arg0: i32) -> (i32, i32) {
    %c0_i32 = arith.constant 0 : i32
    %c0_i32_0 = arith.constant 0 : i32
    %c0_i32_1 = arith.constant 0 : i32
    return %c0_i32, %c0_i32_0 : i32, i32
  }
  func.func @transform_3(%arg0: i32) -> (i32, i32) {
    %c0_i32 = arith.constant 0 : i32
    %c0_i32_0 = arith.constant 0 : i32
    %c0_i32_1 = arith.constant 0 : i32
    return %c0_i32, %c0_i32_0 : i32, i32
  }
  func.func @transform_4(%arg0: i32) -> (i32, i32) {
    %c0_i32 = arith.constant 0 : i32
    %c0_i32_0 = arith.constant 0 : i32
    %c0_i32_1 = arith.constant 0 : i32
    return %c0_i32, %c0_i32_0 : i32, i32
  }
  func.func @transform_5(%arg0: i32) -> (i32, i32) {
    %c0_i32 = arith.constant 0 : i32
    %c0_i32_0 = arith.constant 0 : i32
    %c0_i32_1 = arith.constant 0 : i32
    return %c0_i32, %c0_i32_0 : i32, i32
  }
  func.func @transform_6(%arg0: i32) -> (i32, i32) {
    %c0_i32 = arith.constant 0 : i32
    %c0_i32_0 = arith.constant 0 : i32
    %c0_i32_1 = arith.constant 0 : i32
    return %c0_i32, %c0_i32_0 : i32, i32
  }
  func.func @transform_7(%arg0: i32) -> (i32, i32) {
    %c0_i32 = arith.constant 0 : i32
    %c0_i32_0 = arith.constant 0 : i32
    %c0_i32_1 = arith.constant 0 : i32
    return %c0_i32, %c0_i32_0 : i32, i32
  }
  func.func @transform_8(%arg0: i32) -> (i32, i32) {
    %c0_i32 = arith.constant 0 : i32
    %c0_i32_0 = arith.constant 0 : i32
    %c0_i32_1 = arith.constant 0 : i32
    return %c0_i32, %c0_i32_0 : i32, i32
  }
  func.func @transform_9(%arg0: i32) -> (i32, i32) {
    %c0_i32 = arith.constant 0 : i32
    %c0_i32_0 = arith.constant 0 : i32
    %c0_i32_1 = arith.constant 0 : i32
    return %c0_i32, %c0_i32_0 : i32, i32
  }
  func.func @transform_10(%arg0: i32) -> (i32, i32) {
    %c0_i32 = arith.constant 0 : i32
    %c0_i32_0 = arith.constant 0 : i32
    %c0_i32_1 = arith.constant 0 : i32
    return %c0_i32, %c0_i32_0 : i32, i32
  }
  func.func @transform_11(%arg0: i32) -> (i32, i32) {
    %c0_i32 = arith.constant 0 : i32
    %c0_i32_0 = arith.constant 0 : i32
    %c0_i32_1 = arith.constant 0 : i32
    return %c0_i32, %c0_i32_0 : i32, i32
  }
  func.func @transform_12(%arg0: i32) -> (i32, i32) {
    %c0_i32 = arith.constant 0 : i32
    %c0_i32_0 = arith.constant 0 : i32
    %c0_i32_1 = arith.constant 0 : i32
    return %c0_i32, %c0_i32_0 : i32, i32
  }
  func.func @transform_13(%arg0: i32) -> (i32, i32) {
    %c0_i32 = arith.constant 0 : i32
    %c0_i32_0 = arith.constant 0 : i32
    %c0_i32_1 = arith.constant 0 : i32
    return %c0_i32, %c0_i32_0 : i32, i32
  }
  func.func @transform_14(%arg0: i32) -> (i32, i32) {
    %c0_i32 = arith.constant 0 : i32
    %c0_i32_0 = arith.constant 0 : i32
    return %c0_i32, %arg0 : i32, i32
  }
  func.func @transform_15(%arg0: i32) -> (i32, i32) {
    %c0_i32 = arith.constant 0 : i32
    %c0_i32_0 = arith.constant 0 : i32
    return %c0_i32, %arg0 : i32, i32
  }
  func.func @transform_16(%arg0: i32) -> (i32, i32) {
    %c0_i32 = arith.constant 0 : i32
    %c0_i32_0 = arith.constant 0 : i32
    return %c0_i32, %arg0 : i32, i32
  }
  func.func @transform_17(%arg0: i32) -> (i32, i32) {
    %c0_i32 = arith.constant 0 : i32
    %c0_i32_0 = arith.constant 0 : i32
    return %c0_i32, %arg0 : i32, i32
  }
  func.func @transform_18(%arg0: i32) -> (i32, i32) {
    %c0_i32 = arith.constant 0 : i32
    %c0_i32_0 = arith.constant 0 : i32
    %c0_i32_1 = arith.constant 0 : i32
    return %c0_i32, %c0_i32_0 : i32, i32
  }
}

</mosaic_0001>

<bundles_post_ra>
// kernel: tpu_custom_call.1
= control target key start
LH: loop header
LB: loop body
LE: loop exit
PB: predicated region body
PF: predicated region fallthrough
CT: control target
= control target key end

     0   :  { %s1392_s0 = inlined_call_operand.hbm [shape: bf16[16,16], index: 0, kind: input, shape index: {}]   ;;  %s1393_s1 = inlined_call_operand.vmem [shape: bf16[16,8], index: 1, kind: input, shape index: {}]   ;;  %s1394_s2 = inlined_call_operand.hbm [shape: bf16[8,32], index: 2, kind: input, shape index: {}]   ;;  %s1395_s3 = inlined_call_operand.hbm [shape: f32[1,32], index: 3, kind: input, shape index: {}]   ;;  %s1396_s4 = inlined_call_operand.vmem [shape: bf16[32,32], index: 4, kind: input, shape index: {}]   ;;  %s1397_s5 = inlined_call_operand.hbm [shape: f32[1,32], index: 5, kind: input, shape index: {}]   ;;  %s1398_s6 = inlined_call_operand.hbm [shape: bf16[2,16], index: 6, kind: input, shape index: {}]   ;;  %s1399_s7 = inlined_call_operand.vmem [shape: bf16[32,16], index: 7, kind: input, shape index: {}]   ;;  %s1400_s8 = inlined_call_operand.hbm [shape: f32[1,16], index: 8, kind: input, shape index: {}]   ;;  %s1401_s9 = inlined_call_operand.vmem [shape: f32[2,8], index: 9, kind: input, shape index: {}]   ;;  %s1402_s10 = inlined_call_operand.vmem [shape: bf16[8,32], index: 10, kind: input, shape index: {}]   ;;  %s1403_s11 = inlined_call_operand.vmem [shape: f32[1,32], index: 11, kind: input, shape index: {}]   ;;  %s1404_s12 = inlined_call_operand.vmem [shape: bf16[32,32], index: 12, kind: input, shape index: {}]   ;;  %s1405_s13 = inlined_call_operand.vmem [shape: f32[1,32], index: 13, kind: input, shape index: {}]   ;;  %s1406_s14 = inlined_call_operand.vmem [shape: bf16[32,256], index: 14, kind: input, shape index: {}]   ;;  %s1407_s15 = inlined_call_operand.vmem [shape: f32[1,256], index: 15, kind: input, shape index: {}]   ;;  %s1408_s16 = inlined_call_operand.vmem [shape: f32[1,256], index: 16, kind: input, shape index: {}]   ;;  %s1409_s17 = inlined_call_operand.hbm [shape: f32[2,256], index: 17, kind: output, shape index: {0}]   ;;  %s1410_s18 = inlined_call_operand.hbm [shape: f32[2,16], index: 18, kind: output, shape index: {1}]  }
   0x1   :  { %1414 = sst [smem:[#allocation22_spill]] %s1392_s0 }
   0x2   :  { %1415 = sst [smem:[#allocation23_spill]] %s1393_s1 }
   0x3   :  { %1416 = sst [smem:[#allocation24_spill]] %s1394_s2 }
   0x4   :  { %1417 = sst [smem:[#allocation25_spill]] %s1409_s17 }
   0x5   :  { %24 = vsyncpa [#allocation3], 0 }
   0x6   :  { %25 = vsyncpa [#allocation6], 0 }
   0x7   :  { %26 = vsyncpa [#allocation9], 0 }
   0x8   :  { %27 = vsyncpa [#allocation12], 0 }
   0x9   :  { %28 = vsyncpa [#allocation4], 0 }
   0xa   :  { %29 = vsyncpa [#allocation15], 0  ;;  %s1097_s27 = smov [#allocation5]   ;;  %s1098_s29 = smov [#allocation8]  }
   0xb   :  { %s50_s28 = sshll.u32 %s1097_s27, 4  ;;  %s72_s30 = sshll.u32 %s1098_s29, 4  ;;  %s51_s28 = int_to_ptr.vmem [resolvable:$true] %s50_s28  ;;  %s73_s30 = int_to_ptr.vmem [resolvable:$true] %s72_s30 }
   0xc   :  { %s1418_s1 = sld [smem:[#allocation24_spill]] }
  0x12   :  { %s909_s20 = scalar_lea.hbm %s1418_s1, 64 }
  0x13   :  { %p910_p0 = scmp.ne.s32.totalorder %s1418_s1, %s909_s20  ;;  %p913_p1 = scmp.lt.u32.totalorder %s909_s20, %s1418_s1 }
  0x15   :  { %p915_p2 = pnand %p913_p1, %p910_p0 }
  0x17   :  { %918 = shalt.err (!%p915_p2)
}
  0x18   :  { %s919_s24 = scalar_lea.vmem %s51_s28, 64  ;;  %p924_p4 = scmp.lt.s32.totalorder %s51_s28, %s51_s28 }
  0x19   :  { %p920_p3 = scmp.ne.s32.totalorder %s51_s28, %s919_s24  ;;  %p925_p5 = scmp.lt.s32.totalorder %s919_s24, %s919_s24 }
  0x1b   :  { %p926_p6 = por %p925_p5, %p924_p4 }
  0x1d   :  { %p927_p7 = pnand %p926_p6, %p920_p3 }
  0x1f   :  { %930 = shalt.err (!%p927_p7)
}
  0x20   :  { %53 = dma.hbm_to_vmem [thread:$0]  %s1418_s1, 64, %s51_s28, [#allocation6]  }
  0x21   :  { %s931_s0 = scalar_lea.hbm %s1397_s5, 16 }
  0x22   :  { %p932_p8 = scmp.ne.s32.totalorder %s1397_s5, %s931_s0  ;;  %p935_p9 = scmp.lt.u32.totalorder %s931_s0, %s1397_s5 }
  0x24   :  { %p937_p10 = pnand %p935_p9, %p932_p8 }
  0x26   :  { %940 = shalt.err (!%p937_p10)
}
  0x27   :  { %s941_s2 = scalar_lea.vmem %s73_s30, 16  ;;  %s945_s23 = scalar_lea.vmem %s73_s30, 32 }
  0x28   :  { %p942_p11 = scmp.ne.s32.totalorder %s73_s30, %s941_s2  ;;  %p946_p12 = scmp.lt.s32.totalorder %s73_s30, %s73_s30 }
  0x29   :  { %p947_p13 = scmp.lt.s32.totalorder %s945_s23, %s941_s2 }
  0x2b   :  { %p948_p0 = por %p947_p13, %p946_p12 }
  0x2d   :  { %p949_p1 = pnand %p948_p0, %p942_p11 }
  0x2f   :  { %952 = shalt.err (!%p949_p1)
}
  0x30   :  { %75 = dma.hbm_to_vmem [thread:$0]  %s1397_s5, 16, %s73_s30, [#allocation9]  }
  0x31   :  { %s1099_s24 = smov [#allocation2]   ;;  %s1419_s29 = sld [smem:[#allocation22_spill]] }
  0x32   :  { %s35_s25 = sshll.u32 %s1099_s24, 4  ;;  %s36_s25 = int_to_ptr.vmem [resolvable:$true] %s35_s25 }
  0x37   :  { %s953_s0 = scalar_lea.hbm %s1419_s29, 128 }
  0x38   :  { %p954_p2 = scmp.ne.s32.totalorder %s1419_s29, %s953_s0  ;;  %p957_p3 = scmp.lt.u32.totalorder %s953_s0, %s1419_s29 }
  0x3a   :  { %p959_p4 = pnand %p957_p3, %p954_p2 }
  0x3c   :  { %962 = shalt.err (!%p959_p4)
}
  0x3d   :  { %s963_s2 = scalar_lea.vmem %s36_s25, 128  ;;  %p968_p6 = scmp.lt.s32.totalorder %s36_s25, %s36_s25 }
  0x3e   :  { %p964_p5 = scmp.ne.s32.totalorder %s36_s25, %s963_s2  ;;  %p969_p7 = scmp.lt.s32.totalorder %s963_s2, %s963_s2 }
  0x40   :  { %p970_p8 = por %p969_p7, %p968_p6 }
  0x42   :  { %p971_p9 = pnand %p970_p8, %p964_p5 }
  0x44   :  { %974 = shalt.err (!%p971_p9)
}
  0x45   :  { %s1100_s5 = smov 64   ;;  %s1101_s30 = smov 4  }
  0x46   :  { %41 = dma.hbm_to_vmem [thread:$0]  %s1419_s29, 128, %s36_s25, [#allocation3], %s1100_s5, %s1100_s5, %s1101_s30  }
  0x47   :  { %s1102_s1 = smov [#allocation7]   ;;  %s1103_s26 = smov [#allocation10]  }
  0x48   :  { %s60_s24 = sshll.u32 %s1102_s1, 4  ;;  %s82_s27 = sshll.u32 %s1103_s26, 4  ;;  %s61_s24 = int_to_ptr.vmem [resolvable:$true] %s60_s24  ;;  %s83_s27 = int_to_ptr.vmem [resolvable:$true] %s82_s27 }
  0x49   :  { %s975_s21 = scalar_lea.hbm %s1395_s3, 16 }
  0x4a   :  { %p976_p10 = scmp.ne.s32.totalorder %s1395_s3, %s975_s21  ;;  %p979_p11 = scmp.lt.u32.totalorder %s975_s21, %s1395_s3 }
  0x4c   :  { %p981_p12 = pnand %p979_p11, %p976_p10 }
  0x4e   :  { %984 = shalt.err (!%p981_p12)
}
  0x4f   :  { %s985_s25 = scalar_lea.vmem %s61_s24, 16  ;;  %s989_s29 = scalar_lea.vmem %s61_s24, 32 }
  0x50   :  { %p986_p13 = scmp.ne.s32.totalorder %s61_s24, %s985_s25  ;;  %p990_p0 = scmp.lt.s32.totalorder %s61_s24, %s61_s24 }
  0x51   :  { %p991_p1 = scmp.lt.s32.totalorder %s989_s29, %s985_s25 }
  0x53   :  { %p992_p2 = por %p991_p1, %p990_p0 }
  0x55   :  { %p993_p3 = pnand %p992_p2, %p986_p13 }
  0x57   :  { %996 = shalt.err (!%p993_p3)
}
  0x58   :  { %63 = dma.hbm_to_vmem [thread:$0]  %s1395_s3, 16, %s61_s24, [#allocation6]  }
  0x59   :  { %s997_s17 = scalar_lea.hbm %s1398_s6, 16 }
  0x5a   :  { %p998_p4 = scmp.ne.s32.totalorder %s1398_s6, %s997_s17  ;;  %p1001_p5 = scmp.lt.u32.totalorder %s997_s17, %s1398_s6 }
  0x5c   :  { %p1003_p6 = pnand %p1001_p5, %p998_p4 }
  0x5e   :  { %1006 = shalt.err (!%p1003_p6)
}
  0x5f   :  { %s1007_s21 = scalar_lea.vmem %s83_s27, 16  ;;  %s1011_s20 = scalar_lea.vmem %s83_s27, 32 }
  0x60   :  { %p1008_p7 = scmp.ne.s32.totalorder %s83_s27, %s1007_s21  ;;  %p1012_p8 = scmp.lt.s32.totalorder %s83_s27, %s83_s27 }
  0x61   :  { %p1013_p9 = scmp.lt.s32.totalorder %s1011_s20, %s1007_s21 }
  0x63   :  { %p1014_p10 = por %p1013_p9, %p1012_p8 }
  0x65   :  { %p1015_p11 = pnand %p1014_p10, %p1008_p7 }
  0x67   :  { %1018 = shalt.err (!%p1015_p11)
}
  0x68   :  { %85 = dma.hbm_to_vmem [thread:$0]  %s1398_s6, 16, %s83_s27, [#allocation9]  }
  0x69   :  { %s1104_s22 = smov [#allocation11]   ;;  %s1019_s5 = scalar_lea.hbm %s1400_s8, 16 }
  0x6a   :  { %s94_s2 = sshll.u32 %s1104_s22, 4  ;;  %p1020_p12 = scmp.ne.s32.totalorder %s1400_s8, %s1019_s5  ;;  %s95_s2 = int_to_ptr.vmem [resolvable:$true] %s94_s2 }
  0x6b   :  { %p1023_p13 = scmp.lt.u32.totalorder %s1019_s5, %s1400_s8 }
  0x6d   :  { %p1025_p0 = pnand %p1023_p13, %p1020_p12 }
  0x6f   :  { %1028 = shalt.err (!%p1025_p0)
}
  0x70   :  { %s1029_s1 = scalar_lea.vmem %s95_s2, 16  ;;  %s1033_s6 = scalar_lea.vmem %s95_s2, 32 }
  0x71   :  { %p1030_p1 = scmp.ne.s32.totalorder %s95_s2, %s1029_s1  ;;  %p1034_p2 = scmp.lt.s32.totalorder %s95_s2, %s95_s2 }
  0x72   :  { %p1035_p3 = scmp.lt.s32.totalorder %s1033_s6, %s1029_s1 }
  0x74   :  { %p1036_p4 = por %p1035_p3, %p1034_p2 }
  0x76   :  { %p1037_p5 = pnand %p1036_p4, %p1030_p1 }
  0x78   :  { %1040 = shalt.err (!%p1037_p5)
}
  0x79   :  { %97 = dma.hbm_to_vmem [thread:$0]  %s1400_s8, 16, %s95_s2, [#allocation12]  }
  0x7a   :  { %1085 = dma.done.wait [#allocation3], 128  }
  0x7b   :  { %1086 = vsyncadd [#allocation3], 4294967168 }
  0x7c   :  { %1087 = dma.done.wait [#allocation6], 80  }
  0x7d   :  { %1088 = vsyncadd [#allocation6], 4294967216 }
  0x7e   :  { %1089 = dma.done.wait [#allocation9], 32  }
  0x7f   :  { %1090 = vsyncadd [#allocation9], 4294967264 }
  0x80   :  { %1091 = dma.done.wait [#allocation12], 16  }
  0x81   :  { %1092 = vsyncadd [#allocation12], 4294967280  ;;  %v1105_v0 = vmov 0.0   ;;  %vm1106_vm0 = vmmov 0   ;;  %vm147_vm1 = vcmask 1043456   ;;  %s1420_s19 = sld [smem:[#allocation23_spill]] }
  0x82   :  { %816 = vmatprep.subr.bf16.mxu0 %v1105_v0  ;;  %818 = vmatprep.mubr.msk.bf16.mxu0 %vm1106_vm0, %v1105_v0  ;;  %v137_v1 = vld [vmem:[#allocation5] sm:$0xf]  ;;  %vm143_vm2 = vcmask 64512   ;;  %v886_v9 = vld [vmem:[#allocation2] sm:$0xff]   ;;  %vm205_vm3 = vcmask 130048   ;;  %vm269_vm4 = vcmask 261120  }
  0x83   :  { %822 = vmatprep.subr.bf16.mxu1 %v1105_v0  ;;  %824 = vmatprep.mubr.msk.bf16.mxu1 %vm1106_vm0, %v1105_v0  ;;  %v149_v2 = vsel %vm147_vm1, %v137_v1, 0  ;;  %v887_v10 = vld [vmem:[%s1396_s4] sm:$0xff]   ;;  %v888_v11 = vld [vmem:[%s1396_s4 + $0x8] sm:$0xff]   ;;  %v365_v39 = vld [vmem:[#allocation10] sm:$0x1]  ;;  %s1107_s23 = smov 8  }
  0x84   :  { %817 = vmatpush3.bf16.msra.mxu0 %v149_v2  ;;  %v770_v12 = vld [vmem:[#allocation7] ss:$0 sm:$0xff]  ;;  %v889_v27 = vld [vmem:[%s1399_s7] sm:$0xff]   ;;  %v776_v28 = vld [vmem:[#allocation8] ss:$0 sm:$0xff]  ;;  %vm477_vm5 = vcmask 123904  }
  0x85   :  { %828 = vmatprep.subr.bf16.mxu0 %v1105_v0  ;;  %v494_v37 = vld [vmem:[%s1402_s10] sm:$0xf]  ;;  %v890_v41 = vld [vmem:[%s1399_s7 + $0x8] sm:$0xff]   ;;  %v779_v48 = vld [vmem:[#allocation11] ss:$0 sm:$0xff]  ;;  %s1108_s7 = smov 120  }
  0x86   :  { %v506_v40 = vsel %vm147_vm1, %v494_v37, 0  ;;  %v482_v42 = vld [vmem:[%s1401_s9] sm:$0x3]  ;;  %v892_v63 = vld [vmem:[%s1404_s12 + $0x8] sm:$0xff]   ;;  %s1110_s4 = smov [#allocation14]  }
  0x87   :  { %v885_v3 = vld [vmem:[%s1420_s19] sm:$0xff]   ;;  %484 = vrot.lane.b32.xlu0 %v482_v42, %s1107_s23  ;;  %s752_s22 = sshll.u32 %s1110_s4, 4  ;;  %s753_s22 = int_to_ptr.vmem [resolvable:$true] %s752_s22 }
  0x88   :  { %819 = vmatmul.mubr.msk.bf16.vlgmr.msra.gmra.mrb[0].mxu0 %vm143_vm2, %v885_v3  ;;  %v891_v62 = vld [vmem:[%s1404_s12] sm:$0xff]   ;;  %p1046_p7 = scmp.lt.s32.totalorder %s753_s22, %s753_s22 }
  0x89   :  { %832 = vmatprep.mubr.msk.bf16.mxu0 %vm1106_vm0, %v1105_v0  ;;  %829 = vmatpush3.bf16.msra.mxu0 %v887_v10  ;;  %v893_v1 = vld [vmem:[%s1406_s14] ss:$8 sps:$4 sm:$0xff]   ;;  %v895_v2 = vld [vmem:[%s1406_s14 + $0x4] ss:$8 sps:$4 sm:$0xff]   ;;  %v898_v10 = vld [vmem:[%s1406_s14 + $0x14] ss:$8 sps:$4 sm:$0xff]  }
  0x8a   :  { %830 = vmatprep.subr.bf16.mxu0 %v1105_v0  ;;  %v783_v3 = vld [vmem:[%s1403_s11] ss:$0 sm:$0xff] }
  0x8d   :  { %831 = vmatpush3.bf16.msra.mxu0 %v888_v11  ;;  %v896_v11 = vld [vmem:[%s1406_s14 + $0x10] ss:$8 sps:$4 sm:$0xff]   ;;  %s1041_s14 = scalar_lea.vmem %s753_s22, 32 }
  0x8e   :  { %842 = vmatprep.subr.bf16.mxu0 %v1105_v0  ;;  %p1042_p6 = scmp.ne.s32.totalorder %s753_s22, %s1041_s14  ;;  %p1047_p8 = scmp.lt.s32.totalorder %s1041_s14, %s1041_s14 }
  0x90   :  { %p1048_p9 = por %p1047_p8, %p1046_p7 }
  0x92   :  { %p1049_p10 = pnand %p1048_p9, %p1042_p6 }
  0xf9   :  { %v485_v56 = vpop.permute.xlu0 %484 }
 0x15b   :  { %v185_v4 = vpop.f32.mrb[0].mxu0 }
 0x15c   :  { %v820_v5 = vpop.f32.mrb[1].mxu0 }
 0x15d   :  { %v188_v6 = vpop.f32.mrb[2].mxu0 }
 0x15e   :  { %v192_v7 = vpack.c.bf16 %v188_v6, %v185_v4  ;;  %v821_v8 = vpop.f32.mrb[3].mxu0 }
 0x160   :  { %823 = vmatpush3.bf16.msra.mxu1 %v192_v7 }
 0x161   :  { %836 = vmatprep.subr.bf16.mxu1 %v1105_v0 }
 0x163   :  { %825 = vmatmul.mubr.msk.bf16.vlgmr.msra.gmra.mrb[0].mxu1 %vm205_vm3, %v886_v9 }
 0x164   :  { %838 = vmatprep.mubr.msk.bf16.mxu1 %vm1106_vm0, %v1105_v0 }
 0x236   :  { %v243_v13 = vpop.f32.mrb[0].mxu1 }
 0x237   :  { %v244_v14 = vadd.f32 %v770_v12, %v243_v13  ;;  %v826_v15 = vpop.f32.mrb[1].mxu1  ;;  %v785_v13 = vld [vmem:[%s1405_s13] ss:$0 sm:$0xff] }
 0x238   :  { %v246_v16 = vpop.f32.mrb[2].mxu1 }
 0x239   :  { %v247_v17 = vadd.f32 %v770_v12, %v246_v16  ;;  %v827_v18 = vpop.f32.mrb[3].mxu1  ;;  %v250_v19 = vmax.f32 %v244_v14, 0.0  ;;  %v1109_v12 = vmov 0  }
 0x23b   :  { %v251_v20 = vmax.f32 %v247_v17, 0.0 }
 0x23d   :  { %v252_v21 = vpack.c.bf16 %v251_v20, %v250_v19 }
 0x23f   :  { %833 = vmatmul.mubr.msk.bf16.vlgmr.msra.gmra.mrb[4].mxu0 %vm269_vm4, %v252_v21 }
 0x240   :  { %844 = vmatprep.mubr.msk.bf16.mxu0 %vm1106_vm0, %v1105_v0 }
 0x312   :  { %v307_v22 = vpop.f32.mrb[4].mxu0 }
 0x313   :  { %v834_v23 = vpop.f32.mrb[5].mxu0 }
 0x314   :  { %v310_v24 = vpop.f32.mrb[6].mxu0 }
 0x315   :  { %v314_v25 = vpack.c.bf16 %v310_v24, %v307_v22  ;;  %v835_v26 = vpop.f32.mrb[7].mxu0 }
 0x317   :  { %837 = vmatpush3.bf16.msra.mxu1 %v314_v25 }
 0x318   :  { %848 = vmatprep.subr.bf16.mxu1 %v1105_v0 }
 0x31a   :  { %839 = vmatmul.mubr.msk.bf16.vlgmr.msra.gmra.mrb[4].mxu1 %vm205_vm3, %v886_v9 }
 0x31b   :  { %852 = vmatprep.mubr.msk.bf16.mxu1 %vm1106_vm0, %v1105_v0  ;;  %849 = vmatpush3.bf16.msra.mxu1 %v889_v27 }
 0x31c   :  { %850 = vmatprep.subr.bf16.mxu1 %v1105_v0 }
 0x31f   :  { %851 = vmatpush3.bf16.msra.mxu1 %v890_v41 }
 0x320   :  { %862 = vmatprep.subr.bf16.mxu1 %v1105_v0 }
 0x3ed   :  { %v356_v29 = vpop.f32.mrb[4].mxu1 }
 0x3ee   :  { %v357_v30 = vadd.f32 %v776_v28, %v356_v29  ;;  %v840_v31 = vpop.f32.mrb[5].mxu1 }
 0x3ef   :  { %v359_v32 = vpop.f32.mrb[6].mxu1 }
 0x3f0   :  { %v360_v33 = vadd.f32 %v776_v28, %v359_v32  ;;  %v841_v34 = vpop.f32.mrb[7].mxu1  ;;  %v363_v35 = vmax.f32 %v357_v30, 0.0 }
 0x3f2   :  { %v364_v36 = vmax.f32 %v360_v33, 0.0 }
 0x3f4   :  { %v366_v38 = vpack.c.bf16 %v364_v36, %v363_v35 }
 0x3f6   :  { %843 = vmatpush3.bf16.msra.mxu0 %v366_v38 }
 0x3f7   :  { %856 = vmatprep.subr.bf16.mxu0 %v1105_v0 }
 0x3f9   :  { %845 = vmatmul.mubr.msk.bf16.vlgmr.msra.gmra.mrb[8].mxu0 %vm205_vm3, %v365_v39 }
 0x3fa   :  { %857 = vmatpush3.bf16.msra.mxu0 %v506_v40  ;;  %858 = vmatprep.mubr.msk.bf16.mxu0 %vm1106_vm0, %v1105_v0 }
 0x3fb   :  { %657 = vmatprep.subr.bf16.mxu0 %v895_v2 }
 0x4cc   :  { %v404_v43 = vpop.f32.mrb[8].mxu0 }
 0x4cd   :  { %v410_v44 = vpack.c.bf16 %v404_v43, %v404_v43  ;;  %v846_v45 = vpop.f32.mrb[9].mxu0 }
 0x4ce   :  { %v407_v46 = vpop.f32.mrb[10].mxu0 }
 0x4cf   :  { %853 = vmatmul.mubr.msk.bf16.vlgmr.msra.gmra.mrb[8].mxu1 %vm269_vm4, %v410_v44  ;;  %v847_v47 = vpop.f32.mrb[11].mxu0 }
 0x4d0   :  { %866 = vmatprep.mubr.msk.bf16.mxu1 %vm1106_vm0, %v1105_v0  ;;  %863 = vmatpush3.bf16.msra.mxu1 %v891_v62 }
 0x4d1   :  { %864 = vmatprep.subr.bf16.mxu1 %v1105_v0 }
 0x4d4   :  { %865 = vmatpush3.bf16.msra.mxu1 %v892_v63 }
 0x5a2   :  { %v471_v49 = vpop.f32.mrb[8].mxu1 }
 0x5a3   :  { %v472_v50 = vadd.f32 %v779_v48, %v471_v49  ;;  %v854_v51 = vpop.f32.mrb[9].mxu1 }
 0x5a4   :  { %v474_v52 = vpop.f32.mrb[10].mxu1 }
 0x5a5   :  { %v479_v53 = vmul.f32 0.5, %v472_v50  ;;  %v855_v54 = vpop.f32.mrb[11].mxu1  ;;  %478 = vst.msk [vmem:[#allocation14] sm:$0x3] %vm477_vm5, %v472_v50 }
 0x5a7   :  { %v480_v55 = vmul.f32 1.442695, %v479_v53 }
 0x5a9   :  { %899 = vpow2.f32 %v480_v55 }
 0x5b3   :  { %v900_v57 = vpop.eup %899 }
 0x5b4   :  { %v487_v58 = vmul.f32 %v900_v57, %v485_v56 }
 0x5b6   :  { %489 = vrot.lane.b32.xlu0 %v487_v58, %s1108_s7 }
 0x628   :  { %v490_v59 = vpop.permute.xlu0 %489 }
 0x629   :  { %v492_v60 = vadd.f32 %v490_v59, %v472_v50 }
 0x62b   :  { %v493_v61 = vpack.c.bf16 %v492_v60, %v492_v60 }
 0x62d   :  { %859 = vmatmul.mubr.msk.bf16.vlgmr.msra.gmra.mrb[12].mxu0 %vm143_vm2, %v493_v61 }
 0x62e   :  { %658 = vmatpush1.bf16.msra.mxu0 %v893_v1  ;;  %689 = vmatprep.mubr.bf16.mxu0 %v1109_v12 }
 0x62f   :  { %659 = vmatprep.subr.bf16.mxu0 %v898_v10 }
 0x632   :  { %660 = vmatpush1.bf16.msra.mxu0 %v896_v11 }
 0x700   :  { %v542_v0 = vpop.f32.mrb[12].mxu0 }
 0x701   :  { %v543_v4 = vadd.f32 %v783_v3, %v542_v0  ;;  %v860_v5 = vpop.f32.mrb[13].mxu0 }
 0x702   :  { %v545_v6 = vpop.f32.mrb[14].mxu0 }
 0x703   :  { %v548_v7 = vmax.f32 %v543_v4, 0.0  ;;  %v861_v8 = vpop.f32.mrb[15].mxu0 }
 0x705   :  { %v549_v9 = vpack.c.bf16 %v548_v7, %v548_v7 }
 0x707   :  { %867 = vmatmul.mubr.msk.bf16.vlgmr.msra.gmra.mrb[12].mxu1 %vm269_vm4, %v549_v9 }
 0x7da   :  { %v610_v14 = vpop.f32.mrb[12].mxu1 }
 0x7db   :  { %v611_v15 = vadd.f32 %v785_v13, %v610_v14  ;;  %v868_v16 = vpop.f32.mrb[13].mxu1 }
 0x7dc   :  { %v613_v17 = vpop.f32.mrb[14].mxu1 }
 0x7dd   :  { %v616_v18 = vmax.f32 %v611_v15, 0.0  ;;  %v869_v19 = vpop.f32.mrb[15].mxu1 }
 0x7df   :  { %v617_v20 = vpack.c.bf16 %v616_v18, %v616_v18 }
 0x7e1   :  { %793 = vmatmul.mubr.msk.bf16.vlgmr.msra.gmra.mrb[16].mxu0 %vm269_vm4, %v617_v20 }
 0x7e2   :  { %1052 = shalt.err (!%p1049_p10)
}
 0x7e3   :  { %s1053_s25 = scalar_lea.hbm %s1410_s18, 32 }
 0x7e4   :  { %p1054_p11 = scmp.ne.s32.totalorder %s1410_s18, %s1053_s25  ;;  %p1057_p12 = scmp.lt.u32.totalorder %s1053_s25, %s1410_s18 }
 0x7e6   :  { %p1059_p13 = pnand %p1057_p12, %p1054_p11 }
 0x7e8   :  { %1062 = shalt.err (!%p1059_p13)
}
 0x7e9   :  { %755 = dma.vmem_to_hbm [thread:$0]  %s753_s22, 32, %s1410_s18, [#allocation15]   ;;  %v624_v21 = vlaneseq  ;;  %v622_v24 = vld [vmem:[%s1407_s15] sm:$0x3] }
 0x7ea   :  { %v710_v40 = vld [vmem:[%s1408_s16] sm:$0x3]  ;;  %s1111_s17 = smov [#allocation13]  }
 0x7eb   :  { %v625_v22 = vshrl.u32 %v624_v21, 7  ;;  %s742_s1 = sshll.u32 %s1111_s17, 4  ;;  %s743_s1 = int_to_ptr.vmem [resolvable:$true] %s742_s1 }
 0x7ec   :  { %s1063_s6 = scalar_lea.vmem %s743_s1, 64  ;;  %p1068_p1 = scmp.lt.s32.totalorder %s743_s1, %s743_s1 }
 0x7ed   :  { %v626_v23 = vsub.s32 0, %v625_v22  ;;  %v630_v25 = vsub.s32 1, %v625_v22  ;;  %p1064_p0 = scmp.ne.s32.totalorder %s743_s1, %s1063_s6  ;;  %p1069_p2 = scmp.lt.s32.totalorder %s1063_s6, %s1063_s6 }
 0x7ef   :  { %v627_v26 = vrot.slane %v622_v24, %v626_v23  ;;  %v631_v27 = vrot.slane %v622_v24, %v630_v25  ;;  %v715_v41 = vrot.slane %v710_v40, %v626_v23  ;;  %v719_v42 = vrot.slane %v710_v40, %v630_v25  ;;  %p1070_p3 = por %p1069_p2, %p1068_p1 }
 0x7f1   :  { %p1071_p4 = pnand %p1070_p3, %p1064_p0 }
 0x8b4   :  { %v691_v28 = vpop.f32.mrb[16].mxu0 }
 0x8b5   :  { %v692_v29 = vadd.f32 %v691_v28, %v627_v26  ;;  %v693_v30 = vpop.f32.mrb[17].mxu0 }
 0x8b6   :  { %v694_v31 = vadd.f32 %v693_v30, %v631_v27  ;;  %v695_v32 = vpop.f32.mrb[18].mxu0 }
 0x8b7   :  { %v794_v33 = vmul.f32 -1.442695, %v692_v29  ;;  %v696_v34 = vpop.f32.mrb[19].mxu0 }
 0x8b8   :  { %v795_v35 = vmul.f32 -1.442695, %v694_v31 }
 0x8b9   :  { %901 = vpow2.f32 %v794_v33 }
 0x8ba   :  { %903 = vpow2.f32 %v795_v35 }
 0x8c3   :  { %v902_v36 = vpop.eup %901 }
 0x8c4   :  { %v904_v37 = vpop.eup %903  ;;  %v704_v38 = vadd.f32 1.0, %v902_v36 }
 0x8c5   :  { %v705_v39 = vadd.f32 1.0, %v904_v37 }
 0x8c6   :  { %905 = vrcp.f32 %v704_v38 }
 0x8c7   :  { %907 = vrcp.f32 %v705_v39 }
 0x8d0   :  { %v906_v43 = vpop.eup %905 }
 0x8d1   :  { %v908_v44 = vpop.eup %907  ;;  %v722_v45 = vmul.f32 %v906_v43, %v715_v41 }
 0x8d2   :  { %v723_v46 = vmul.f32 %v908_v44, %v719_v42 }
 0x8d4   :  { %v726_v47 = vcombine.low %v722_v45, %v723_v46 }
 0x8d6   :  { %796 = vst.sshfl [vmem:[#allocation13] sm:$0x33 pattern:$0x76325410] %v726_v47 }
 0x8d7   :  { %1074 = shalt.err (!%p1071_p4)
}
 0x8d8   :  { %s1421_s26 = sld [smem:[#allocation25_spill]] }
 0x8de   :  { %s1075_s8 = scalar_lea.hbm %s1421_s26, 64 }
 0x8df   :  { %p1076_p5 = scmp.ne.s32.totalorder %s1421_s26, %s1075_s8  ;;  %p1079_p6 = scmp.lt.u32.totalorder %s1075_s8, %s1421_s26 }
 0x8e1   :  { %p1081_p7 = pnand %p1079_p6, %p1076_p5 }
 0x8e3   :  { %1084 = shalt.err (!%p1081_p7)
}
 0x8e4   :  { %745 = dma.vmem_to_hbm [thread:$0]  %s743_s1, 64, %s1421_s26, [#allocation4]  }
 0x8e5   :  { %1093 = dma.done.wait [#allocation4], 64  }
 0x8e6   :  { %1094 = vsyncadd [#allocation4], 4294967232 }
 0x8e7   :  { %1095 = dma.done.wait [#allocation15], 32  }
 0x8e8   :  { %1096 = vsyncadd [#allocation15], 4294967264 }
 0x8e9   :  { %762 = vsyncpa [#allocation3], 1 }
 0x8ea   :  { %763 = vsyncpa [#allocation6], 1 }
 0x8eb   :  { %764 = vsyncpa [#allocation9], 1 }
 0x8ec   :  { %765 = vsyncpa [#allocation12], 1 }
 0x8ed   :  { %766 = vsyncpa [#allocation4], 1 }
 0x8ee   :  { %767 = vsyncpa [#allocation15], 1 }

</bundles_post_ra>
